<compile_context>
chip_gen: v5e
topology: v5e:2x2
jax: 0.10.0
libtpu: 0.0.40
codegen_flags: <defaults>
</compile_context>

<pallas_src>
import jax
import jax.numpy as jnp
from jax.experimental import pallas as pl
from jax.experimental.pallas import tpu as pltpu

HIDDEN_DIM = 32                     # bert.hidden_dim (small synthetic size)
MLP_DIM = 64                        # first classifier layer width
CLASS_NUM = 52                      # default class_num
CLASS_PAD = 64                      # 52 padded so PACK*CLASS_PAD is lane-dense
PACK = 4                            # tokens packed per 128-lane row (4 * 32 = 128)
PACKED_H = PACK * HIDDEN_DIM        # 128
PACKED_MLP = PACK * MLP_DIM         # 256
PACKED_OUT = PACK * CLASS_PAD       # 256
TM4_PREF = 2048                     # packed rows per grid step (= 8192 tokens)


def _round_up(x, m):
    return (x + m - 1) // m * m


def classifier_kernel(x_ref, w1_ref, b1_ref, w2_ref, b2_ref, o_ref):
    """Fused MLP head on one packed token tile (4 tokens per 128-lane row).

    o = relu(x @ W1_blockdiag + b1) @ W2_blockdiag + b2

    x arrives as f32 (no standalone wrapper cast pass); the in-kernel bf16 cast
    is 128-lane dense and feeds the MXU bf16 path. All accumulation plus the
    bias-add / ReLU stay in f32.
    """
    x = x_ref[...].astype(jnp.bfloat16)                                   # (TM4, 128)
    h = jnp.dot(x, w1_ref[...], preferred_element_type=jnp.float32)      # (TM4, 256) MXU, f32 acc
    h = jnp.maximum(h + b1_ref[...], 0.0)                                 # bias + ReLU in f32 (VPU)
    o = jnp.dot(h.astype(jnp.bfloat16), w2_ref[...],
                preferred_element_type=jnp.float32)                       # (TM4, 256) MXU, f32 acc
    o_ref[...] = (o + b2_ref[...]).astype(o_ref.dtype)                    # lane-dense bf16 store


def _pack_weights(w1, b1, w2, b2):
    """Build block-diagonal bf16 weights / tiled f32 biases for 4-token packing."""
    w1_bd = jax.scipy.linalg.block_diag(*([w1] * PACK)).astype(jnp.bfloat16)   # (128, 256)
    w2p = jnp.pad(w2, ((0, 0), (0, CLASS_PAD - w2.shape[1])))                   # (64, 64)
    w2_bd = jax.scipy.linalg.block_diag(*([w2p] * PACK)).astype(jnp.bfloat16)  # (256, 256)
    b1_t = jnp.tile(b1.astype(jnp.float32), PACK).reshape(1, PACKED_MLP)        # (1, 256)
    b2p = jnp.pad(b2.astype(jnp.float32), ((0, CLASS_PAD - b2.shape[0]),))
    b2_t = jnp.tile(b2p, PACK).reshape(1, PACKED_OUT)                           # (1, 256)
    return w1_bd, b1_t, w2_bd, b2_t


def _choose_block_rows(rows, pref=TM4_PREF):
    """Packed-row tile size: big tiles, but >=2 grid steps when possible (v7x 2 TCs)."""
    if rows <= 8:
        return rows                                  # single full-extent block
    if rows <= pref:
        return _round_up(pl.cdiv(rows, 2), 8)        # ~2 balanced steps
    return pref


def token_classifier_head(x_tokens, w1, b1, w2, b2):
    """Fused classifier head over all tokens, tiled along the packed-token axis."""
    B, S, H = x_tokens.shape
    assert H == HIDDEN_DIM
    assert w1.shape == (HIDDEN_DIM, MLP_DIM) and w2.shape == (MLP_DIM, CLASS_NUM)

    M = B * S
    M_pad = _round_up(M, PACK)
    x2d = x_tokens.reshape(M, H).astype(jnp.float32)   # no-op cast when x is already f32
    if M_pad != M:
        # Only hit when B*S % 4 != 0 (at most 3 garbage rows, discarded by the
        # [:M] slice below).
        x2d = jnp.pad(x2d, ((0, M_pad - M), (0, 0)))
    rows = M_pad // PACK
    x_packed = x2d.reshape(rows, PACKED_H)             # free, bit-exact 4-token packing

    w1_bd, b1_t, w2_bd, b2_t = _pack_weights(w1, b1, w2, b2)

    tm4 = _choose_block_rows(rows)
    grid = (pl.cdiv(rows, tm4),)                        # ragged last block handled by Pallas

    out = pl.pallas_call(
        classifier_kernel,
        out_shape=jax.ShapeDtypeStruct((rows, PACKED_OUT), jnp.bfloat16),
        grid_spec=pltpu.PrefetchScalarGridSpec(
            num_scalar_prefetch=0,
            grid=grid,
            in_specs=[
                pl.BlockSpec((tm4, PACKED_H), lambda i: (i, 0)),           # packed tokens, pipelined
                pl.BlockSpec((PACKED_H, PACKED_MLP), lambda i: (0, 0)),    # W1 block-diag (bf16)
                pl.BlockSpec((1, PACKED_MLP), lambda i: (0, 0)),           # b1 tiled (f32)
                pl.BlockSpec((PACKED_MLP, PACKED_OUT), lambda i: (0, 0)),  # W2 block-diag (bf16)
                pl.BlockSpec((1, PACKED_OUT), lambda i: (0, 0)),           # b2 tiled (f32)
            ],
            out_specs=pl.BlockSpec((tm4, PACKED_OUT), lambda i: (i, 0)),
        ),
        compiler_params=pltpu.CompilerParams(
            dimension_semantics=("parallel",),          # shards steps across v7x's 2 TCs
            vmem_limit_bytes=48 * 1024 * 1024,
        ),
    )(x_packed, w1_bd, b1_t, w2_bd, b2_t)

    # (rows, 256) -> (M_pad, 64): free, bit-exact unpacking of the 4 tokens per row.
    logits = out.reshape(M_pad, CLASS_PAD)[:M, :CLASS_NUM]
    # Returned in bf16; downstream loss/argmax consumes bf16 (no f32 copy pass).
    return logits.reshape(B, S, CLASS_NUM)


def bert_stub(x, attn_mask=None, timestamp=None):
    # TODO(synk): `bert` is an injected submodule with no architecture defined in the
    # spec; modeled here as an identity encoder over (B, S, hidden_dim) token features.
    return x


def token_classifier_forward(x, params, attn_mask=None, timestamp=None):
    x = bert_stub(x, attn_mask, timestamp)
    w1, b1, w2, b2 = params
    return token_classifier_head(x, w1, b1, w2, b2)


def init_params(key):
    # Matches PyTorch nn.Linear default init: U(-1/sqrt(fan_in), +1/sqrt(fan_in)).
    k1, k2, k3, k4 = jax.random.split(key, 4)
    bound1 = 1.0 / jnp.sqrt(jnp.float32(HIDDEN_DIM))
    bound2 = 1.0 / jnp.sqrt(jnp.float32(MLP_DIM))
    w1 = jax.random.uniform(k1, (HIDDEN_DIM, MLP_DIM), jnp.float32, -bound1, bound1)
    b1 = jax.random.uniform(k2, (MLP_DIM,), jnp.float32, -bound1, bound1)
    w2 = jax.random.uniform(k3, (MLP_DIM, CLASS_NUM), jnp.float32, -bound2, bound2)
    b2 = jax.random.uniform(k4, (CLASS_NUM,), jnp.float32, -bound2, bound2)
    return w1, b1, w2, b2


if __name__ == "__main__":
    key = jax.random.PRNGKey(0)
    kx, kp = jax.random.split(key)

    B, S = 2, 8
    x = jax.random.normal(kx, (B, S, HIDDEN_DIM), jnp.float32)
    params = init_params(kp)

    fwd = jax.jit(token_classifier_forward)
    out = fwd(x, params)
    out = jax.block_until_ready(out)
    assert out.shape == (B, S, CLASS_NUM), out.shape

    # Pure-JAX reference mirroring the kernel's bf16 operand rounding (x, W1, W2,
    # and the intermediate h are fed to the MXU as bf16; accumulation is f32).
    w1, b1, w2, b2 = params
    f32 = jnp.float32
    xb = x.reshape(-1, HIDDEN_DIM).astype(jnp.bfloat16).astype(f32)
    w1b = w1.astype(jnp.bfloat16).astype(f32)
    w2b = w2.astype(jnp.bfloat16).astype(f32)
    h = jnp.maximum(xb @ w1b + b1, 0.0)
    ref = (h.astype(jnp.bfloat16).astype(f32) @ w2b + b2).reshape(B, S, CLASS_NUM)

    out_f = out.astype(f32)
    err = float(jnp.abs(out_f - ref).max())
    assert jnp.allclose(out_f, ref, atol=5e-2, rtol=5e-2), err

    print("KERNEL_OK")
</pallas_src>

<mosaic_0001>
module attributes {stable_mosaic.version = 11 : i64} {
  func.func @classifier_kernel(%arg0: i32, %arg1: memref<4x128xf32, #tpu.memory_space<vmem>>, %arg2: memref<128x256xbf16, #tpu.memory_space<vmem>>, %arg3: memref<1x256xf32, #tpu.memory_space<vmem>>, %arg4: memref<256x256xbf16, #tpu.memory_space<vmem>>, %arg5: memref<1x256xf32, #tpu.memory_space<vmem>>, %arg6: memref<4x256xbf16, #tpu.memory_space<vmem>>) attributes {dimension_semantics = [#tpu.dimension_semantics<parallel>], iteration_bounds = array<i64: 1>, scalar_prefetch = 0 : i64, scratch_operands = 0 : i64, tpu.core_type = #tpu.core_type<tc>, window_params = [{transform_indices = @transform_0, window_bounds = array<i64: 4, 128>}, {pipeline_mode = #tpu.pipeline_mode<synchronous>, transform_indices = @transform_1, window_bounds = array<i64: 128, 256>}, {pipeline_mode = #tpu.pipeline_mode<synchronous>, transform_indices = @transform_2, window_bounds = array<i64: 1, 256>}, {pipeline_mode = #tpu.pipeline_mode<synchronous>, transform_indices = @transform_3, window_bounds = array<i64: 256, 256>}, {pipeline_mode = #tpu.pipeline_mode<synchronous>, transform_indices = @transform_4, window_bounds = array<i64: 1, 256>}, {transform_indices = @transform_5, window_bounds = array<i64: 4, 256>}]} {
    %c0 = arith.constant 0 : index
    %c0_0 = arith.constant 0 : index
    %0 = vector.load %arg1[%c0, %c0_0] : memref<4x128xf32, #tpu.memory_space<vmem>>, vector<4x128xf32>
    %1 = arith.truncf %0 : vector<4x128xf32> to vector<4x128xbf16>
    %c0_1 = arith.constant 0 : index
    %c0_2 = arith.constant 0 : index
    %2 = vector.load %arg2[%c0_1, %c0_2] : memref<128x256xbf16, #tpu.memory_space<vmem>>, vector<128x256xbf16>
    %cst = arith.constant dense<0.000000e+00> : vector<4x256xf32>
    %3 = tpu.matmul %1, %2, %cst {dimension_numbers = #tpu.dot_dimension_numbers<[1], [0], [0], [1], [0, 0, 1, 1], [], []>} : vector<4x128xbf16>, vector<128x256xbf16>, vector<4x256xf32> -> vector<4x256xf32>
    %c0_3 = arith.constant 0 : index
    %c0_4 = arith.constant 0 : index
    %4 = vector.load %arg3[%c0_3, %c0_4] : memref<1x256xf32, #tpu.memory_space<vmem>>, vector<1x256xf32>
    %5 = vector.broadcast %4 : vector<1x256xf32> to vector<4x256xf32>
    %6 = arith.addf %3, %5 : vector<4x256xf32>
    %cst_5 = arith.constant 0.000000e+00 : f32
    %7 = vector.broadcast %cst_5 : f32 to vector<4x256xf32>
    %8 = arith.maximumf %6, %7 : vector<4x256xf32>
    %9 = arith.truncf %8 : vector<4x256xf32> to vector<4x256xbf16>
    %c0_6 = arith.constant 0 : index
    %c0_7 = arith.constant 0 : index
    %10 = vector.load %arg4[%c0_6, %c0_7] : memref<256x256xbf16, #tpu.memory_space<vmem>>, vector<256x256xbf16>
    %cst_8 = arith.constant dense<0.000000e+00> : vector<4x256xf32>
    %11 = tpu.matmul %9, %10, %cst_8 {dimension_numbers = #tpu.dot_dimension_numbers<[1], [0], [0], [1], [0, 0, 1, 1], [], []>} : vector<4x256xbf16>, vector<256x256xbf16>, vector<4x256xf32> -> vector<4x256xf32>
    %c0_9 = arith.constant 0 : index
    %c0_10 = arith.constant 0 : index
    %12 = vector.load %arg5[%c0_9, %c0_10] : memref<1x256xf32, #tpu.memory_space<vmem>>, vector<1x256xf32>
    %13 = vector.broadcast %12 : vector<1x256xf32> to vector<4x256xf32>
    %14 = arith.addf %11, %13 : vector<4x256xf32>
    %15 = arith.truncf %14 : vector<4x256xf32> to vector<4x256xbf16>
    %c0_11 = arith.constant 0 : index
    %c0_12 = arith.constant 0 : index
    %16 = vector.load %arg6[%c0_11, %c0_12] : memref<4x256xbf16, #tpu.memory_space<vmem>>, vector<4x256xbf16>
    tpu.vector_store %arg6[%c0_11, %c0_12], %15 {strides = array<i32>} : memref<4x256xbf16, #tpu.memory_space<vmem>>, vector<4x256xbf16>,
    return
  }
  func.func @transform_0(%arg0: i32) -> (i32, i32) {
    %c0_i32 = arith.constant 0 : i32
    %c0_i32_0 = arith.constant 0 : i32
    return %arg0, %c0_i32 : i32, i32
  }
  func.func @transform_1(%arg0: i32) -> (i32, i32) {
    %c0_i32 = arith.constant 0 : i32
    %c0_i32_0 = arith.constant 0 : i32
    %c0_i32_1 = arith.constant 0 : i32
    return %c0_i32, %c0_i32_0 : i32, i32
  }
  func.func @transform_2(%arg0: i32) -> (i32, i32) {
    %c0_i32 = arith.constant 0 : i32
    %c0_i32_0 = arith.constant 0 : i32
    %c0_i32_1 = arith.constant 0 : i32
    return %c0_i32, %c0_i32_0 : i32, i32
  }
  func.func @transform_3(%arg0: i32) -> (i32, i32) {
    %c0_i32 = arith.constant 0 : i32
    %c0_i32_0 = arith.constant 0 : i32
    %c0_i32_1 = arith.constant 0 : i32
    return %c0_i32, %c0_i32_0 : i32, i32
  }
  func.func @transform_4(%arg0: i32) -> (i32, i32) {
    %c0_i32 = arith.constant 0 : i32
    %c0_i32_0 = arith.constant 0 : i32
    %c0_i32_1 = arith.constant 0 : i32
    return %c0_i32, %c0_i32_0 : i32, i32
  }
  func.func @transform_5(%arg0: i32) -> (i32, i32) {
    %c0_i32 = arith.constant 0 : i32
    %c0_i32_0 = arith.constant 0 : i32
    return %arg0, %c0_i32 : i32, i32
  }
}

</mosaic_0001>

<bundles_post_ra>
// kernel: tile.18
= control target key start
LH: loop header
LB: loop body
LE: loop exit
PB: predicated region body
PF: predicated region fallthrough
CT: control target
= control target key end

     0   :  { %s22_s0 = inlined_call_operand.vmem [shape: f32[64], index: 0, kind: input, shape index: {}]   ;;  %s23_s1 = inlined_call_operand.vmem [shape: f32[4,64], index: 1, kind: output, shape index: {}]  }
   0x1   :  { %v4_v0 = vld [vmem:[%s22_s0] ss:$0 sm:$0xff] }
   0x2   :  { %5 = vst [vmem:[%s23_s1] sm:$0xf] %v4_v0 }

// kernel: tile.19
= control target key start
LH: loop header
LB: loop body
LE: loop exit
PB: predicated region body
PF: predicated region fallthrough
CT: control target
= control target key end

     0   :  { %s6_s8 = smov 3  ;;  %vm8_vm0 = vcmask 523264   ;;  %s31_s9 = smov 64   ;;  %vm15_vm1 = vcmask 1048064   ;;  %s51_s0 = inlined_call_operand.vmem [shape: f32[4,64], index: 0, kind: input, shape index: {}]   ;;  %s52_s1 = inlined_call_operand.vmem [shape: f32[1,256], index: 1, kind: output, shape index: {}]  }
   0x1   :  { %v4_v0 = vld [vmem:[%s51_s0] sm:$0xf]  ;;  %s11_s0 = smov 3 }
   0x2   :  { %5 = vst [vmem:[#allocation1] sm:$0xf] %v4_v0 }
   0x9   :  { %v12_v1 = vld [vmem:[#allocation1 + $0x1] ss:$2 sm:%s11_s0]   ;;  %v7_v2 = vld [vmem:[#allocation1] ss:$2 sm:%s6_s8]  }
   0xa   :  { %13 = vrot.lane.b32.xlu0 %v12_v1, %s31_s9  ;;  %9 = vst.msk [vmem:[#allocation0] ss:$8 sm:$0x3] %vm8_vm0, %v7_v2  }
  0x7c   :  { %v14_v3 = vpop.permute.xlu0 %13  }
  0x7d   :  { %16 = vst.msk [vmem:[#allocation0] ss:$8 sm:$0x3] %vm15_vm1, %v14_v3  }
  0x84   :  { %v19_v4 = vld [vmem:[#allocation0] sm:$0x1]  ;;  %v24_v5 = vld [vmem:[#allocation0 + $0x8] sm:$0x1] }
  0x85   :  { %22 = vst [vmem:[%s52_s1] sm:$0x1] %v19_v4 }
  0x86   :  { %29 = vst [vmem:[%s52_s1 + $0x1] sm:$0x1] %v24_v5 }

// kernel: token_classifier_forward.1
= control target key start
LH: loop header
LB: loop body
LE: loop exit
PB: predicated region body
PF: predicated region fallthrough
CT: control target
= control target key end

     0   :  { %vm407_vm0 = vcmask 1041408   ;;  %s987_s1 = inlined_call_operand.vmem [shape: bf16[128,256], index: 1, kind: input, shape index: {}]   ;;  %s988_s3 = inlined_call_operand.vmem [shape: bf16[256,256], index: 3, kind: input, shape index: {}]   ;;  %s989_s0 = inlined_call_operand.vmem [shape: f32[4,128], index: 0, kind: input, shape index: {}]   ;;  %s990_s2 = inlined_call_operand.vmem [shape: f32[1,256], index: 2, kind: input, shape index: {}]   ;;  %s991_s4 = inlined_call_operand.vmem [shape: f32[1,256], index: 4, kind: input, shape index: {}]   ;;  %s992_s5 = inlined_call_operand.vmem [shape: bf16[4,256], index: 5, kind: output, shape index: {}]  }
   0x1   :  { %v475_v0 = vld [vmem:[%s987_s1 + $0x70] sm:$0xf]  ;;  %v624_v1 = vld [vmem:[%s987_s1 + $0x74] sm:$0xf0]  ;;  %v623_v2 = vld [vmem:[%s987_s1 + $0x74] sm:$0xf] }
   0x2   :  { %v476_v3 = vor.u32 %v624_v1, %v475_v0  ;;  %v477_v4 = vld [vmem:[%s987_s1 + $0x78] sm:$0xf0]  ;;  %v467_v5 = vld [vmem:[%s987_s1 + $0x60] sm:$0xf]  ;;  %v622_v6 = vld [vmem:[%s987_s1 + $0x64] sm:$0xf0] }
   0x3   :  { %v480_v7 = vor.u32 %v623_v2, %v477_v4  ;;  %v621_v8 = vld [vmem:[%s987_s1 + $0x64] sm:$0xf]  ;;  %v469_v9 = vld [vmem:[%s987_s1 + $0x68] sm:$0xf0]  ;;  %v468_v10 = vor.u32 %v622_v6, %v467_v5  ;;  %v459_v12 = vld [vmem:[%s987_s1 + $0x50] sm:$0xf] }
   0x4   :  { %124 = vmatpush.bf16.msra.mxu0 %v476_v3  ;;  %v472_v11 = vor.u32 %v621_v8, %v469_v9  ;;  %v620_v13 = vld [vmem:[%s987_s1 + $0x54] sm:$0xf0]  ;;  %v619_v14 = vld [vmem:[%s987_s1 + $0x54] sm:$0xf]  ;;  %v461_v15 = vld [vmem:[%s987_s1 + $0x58] sm:$0xf0] }
   0x5   :  { %137 = vmatpush.bf16.msra.mxu1 %v480_v7  ;;  %v460_v16 = vor.u32 %v620_v13, %v459_v12  ;;  %v464_v17 = vor.u32 %v619_v14, %v461_v15  ;;  %v451_v18 = vld [vmem:[%s987_s1 + $0x40] sm:$0xf]  ;;  %v618_v19 = vld [vmem:[%s987_s1 + $0x44] sm:$0xf0]  ;;  %v617_v20 = vld [vmem:[%s987_s1 + $0x44] sm:$0xf] }
   0x6   :  { %v453_v21 = vld [vmem:[%s987_s1 + $0x48] sm:$0xf0]  ;;  %v452_v22 = vor.u32 %v618_v19, %v451_v18  ;;  %v539_v23 = vld [vmem:[%s988_s3 + $0x70] sm:$0xf]  ;;  %v640_v24 = vld [vmem:[%s988_s3 + $0x74] sm:$0xf0] }
   0x7   :  { %v603_v25 = vld [vmem:[%s988_s3 + $0xf0] sm:$0xf]  ;;  %v456_v26 = vor.u32 %v617_v20, %v453_v21  ;;  %v616_v28 = vld [vmem:[%s987_s1 + $0x34] sm:$0xf0]  ;;  %v540_v29 = vor.u32 %v640_v24, %v539_v23  ;;  %v615_v31 = vld [vmem:[%s987_s1 + $0x34] sm:$0xf] }
   0x8   :  { %125 = vmatpush.bf16.msra.mxu0 %v468_v10  ;;  %v443_v27 = vld [vmem:[%s987_s1 + $0x30] sm:$0xf]  ;;  %v656_v30 = vld [vmem:[%s988_s3 + $0xf4] sm:$0xf0]  ;;  %v445_v32 = vld [vmem:[%s987_s1 + $0x38] sm:$0xf0] }
   0x9   :  { %138 = vmatpush.bf16.msra.mxu1 %v472_v11  ;;  %v604_v33 = vor.u32 %v656_v30, %v603_v25  ;;  %v531_v34 = vld [vmem:[%s988_s3 + $0x60] sm:$0xf]  ;;  %352 = vmatpush.bf16.msra.mxu2 %v540_v29  ;;  %v638_v35 = vld [vmem:[%s988_s3 + $0x64] sm:$0xf0]  ;;  %v444_v38 = vor.u32 %v616_v28, %v443_v27  ;;  %v448_v43 = vor.u32 %v615_v31, %v445_v32  ;;  %v613_v44 = vld [vmem:[%s987_s1 + $0x24] sm:$0xf] }
   0xa   :  { %v595_v36 = vld [vmem:[%s988_s3 + $0xe0] sm:$0xf]  ;;  %v654_v37 = vld [vmem:[%s988_s3 + $0xe4] sm:$0xf0]  ;;  %v532_v41 = vor.u32 %v638_v35, %v531_v34  ;;  %v523_v45 = vld [vmem:[%s988_s3 + $0x50] sm:$0xf] }
   0xb   :  { %v435_v39 = vld [vmem:[%s987_s1 + $0x20] sm:$0xf]  ;;  %v614_v40 = vld [vmem:[%s987_s1 + $0x24] sm:$0xf0]  ;;  %365 = vmatpush.bf16.msra.mxu3 %v604_v33  ;;  %v596_v42 = vor.u32 %v654_v37, %v595_v36  ;;  %v636_v46 = vld [vmem:[%s988_s3 + $0x54] sm:$0xf0] }
   0xc   :  { %126 = vmatpush.bf16.msra.mxu0 %v460_v16  ;;  %v437_v47 = vld [vmem:[%s987_s1 + $0x28] sm:$0xf0]  ;;  %v587_v48 = vld [vmem:[%s988_s3 + $0xd0] sm:$0xf]  ;;  %v652_v49 = vld [vmem:[%s988_s3 + $0xd4] sm:$0xf0]  ;;  %v524_v50 = vor.u32 %v636_v46, %v523_v45  ;;  %v436_v51 = vor.u32 %v614_v40, %v435_v39 }
   0xd   :  { %139 = vmatpush.bf16.msra.mxu1 %v464_v17  ;;  %353 = vmatpush.bf16.msra.mxu2 %v532_v41  ;;  %v427_v52 = vld [vmem:[%s987_s1 + $0x10] sm:$0xf]  ;;  %v588_v53 = vor.u32 %v652_v49, %v587_v48  ;;  %v515_v54 = vld [vmem:[%s988_s3 + $0x40] sm:$0xf]  ;;  %v634_v55 = vld [vmem:[%s988_s3 + $0x44] sm:$0xf0]  ;;  %v440_v56 = vor.u32 %v613_v44, %v437_v47 }
   0xe   :  { %v612_v57 = vld [vmem:[%s987_s1 + $0x14] sm:$0xf0]  ;;  %v579_v58 = vld [vmem:[%s988_s3 + $0xc0] sm:$0xf]  ;;  %v650_v59 = vld [vmem:[%s988_s3 + $0xc4] sm:$0xf0]  ;;  %v516_v63 = vor.u32 %v634_v55, %v515_v54 }
   0xf   :  { %366 = vmatpush.bf16.msra.mxu3 %v596_v42  ;;  %v611_v60 = vld [vmem:[%s987_s1 + $0x14] sm:$0xf]  ;;  %v429_v61 = vld [vmem:[%s987_s1 + $0x18] sm:$0xf0]  ;;  %v419_v62 = vld [vmem:[%s987_s1] sm:$0xf]  ;;  %v428_v0 = vor.u32 %v612_v57, %v427_v52  ;;  %v580_v2 = vor.u32 %v650_v59, %v579_v58 }
  0x10   :  { %127 = vmatpush.bf16.msra.mxu0 %v452_v22  ;;  %v610_v1 = vld [vmem:[%s987_s1 + $0x4] sm:$0xf0]  ;;  %v507_v3 = vld [vmem:[%s988_s3 + $0x30] sm:$0xf]  ;;  %v632_v4 = vld [vmem:[%s988_s3 + $0x34] sm:$0xf0]  ;;  %v432_v5 = vor.u32 %v611_v60, %v429_v61 }
  0x11   :  { %140 = vmatpush.bf16.msra.mxu1 %v456_v26  ;;  %354 = vmatpush.bf16.msra.mxu2 %v524_v50  ;;  %v609_v6 = vld [vmem:[%s987_s1 + $0x4] sm:$0xf]  ;;  %v571_v7 = vld [vmem:[%s988_s3 + $0xb0] sm:$0xf]  ;;  %v648_v8 = vld [vmem:[%s988_s3 + $0xb4] sm:$0xf0]  ;;  %v508_v14 = vor.u32 %v632_v4, %v507_v3  ;;  %v420_v15 = vor.u32 %v610_v1, %v419_v62 }
  0x12   :  { %v421_v9 = vld [vmem:[%s987_s1 + $0x8] sm:$0xf0]  ;;  %v639_v10 = vld [vmem:[%s988_s3 + $0x74] sm:$0xf]  ;;  %v541_v11 = vld [vmem:[%s988_s3 + $0x78] sm:$0xf0]  ;;  %v572_v17 = vor.u32 %v648_v8, %v571_v7 }
  0x13   :  { %367 = vmatpush.bf16.msra.mxu3 %v588_v53  ;;  %v655_v12 = vld [vmem:[%s988_s3 + $0xf4] sm:$0xf]  ;;  %v605_v13 = vld [vmem:[%s988_s3 + $0xf8] sm:$0xf0]  ;;  %v20_v16 = vld [vmem:[%s989_s0] sm:$0xf]  ;;  %v424_v20 = vor.u32 %v609_v6, %v421_v9  ;;  %v544_v21 = vor.u32 %v639_v10, %v541_v11 }
  0x14   :  { %128 = vmatpush.bf16.msra.mxu0 %v444_v38  ;;  %v499_v18 = vld [vmem:[%s988_s3 + $0x20] sm:$0xf]  ;;  %v630_v19 = vld [vmem:[%s988_s3 + $0x24] sm:$0xf0]  ;;  %v608_v24 = vor.u32 %v655_v12, %v605_v13  ;;  %v637_v25 = vld [vmem:[%s988_s3 + $0x64] sm:$0xf]  ;;  %v21_v27 = vpack.c.bf16 %v20_v16, %v20_v16 }
  0x15   :  { %141 = vmatpush.bf16.msra.mxu1 %v448_v43  ;;  %355 = vmatpush.bf16.msra.mxu2 %v516_v63  ;;  %v563_v22 = vld [vmem:[%s988_s3 + $0xa0] sm:$0xf]  ;;  %v646_v23 = vld [vmem:[%s988_s3 + $0xa4] sm:$0xf0]  ;;  %v533_v26 = vld [vmem:[%s988_s3 + $0x68] sm:$0xf0]  ;;  %v500_v30 = vor.u32 %v630_v19, %v499_v18 }
  0x16   :  { %v653_v28 = vld [vmem:[%s988_s3 + $0xe4] sm:$0xf]  ;;  %v597_v29 = vld [vmem:[%s988_s3 + $0xe8] sm:$0xf0]  ;;  %v564_v31 = vor.u32 %v646_v23, %v563_v22  ;;  %v536_v32 = vor.u32 %v637_v25, %v533_v26  ;;  %v635_v34 = vld [vmem:[%s988_s3 + $0x54] sm:$0xf] }
  0x17   :  { %368 = vmatpush.bf16.msra.mxu3 %v580_v2  ;;  %v600_v33 = vor.u32 %v653_v28, %v597_v29  ;;  %v525_v35 = vld [vmem:[%s988_s3 + $0x58] sm:$0xf0]  ;;  %v651_v36 = vld [vmem:[%s988_s3 + $0xd4] sm:$0xf]  ;;  %v633_v40 = vld [vmem:[%s988_s3 + $0x44] sm:$0xf] }
  0x18   :  { %129 = vmatpush.bf16.msra.mxu0 %v436_v51  ;;  %v589_v37 = vld [vmem:[%s988_s3 + $0xd8] sm:$0xf0]  ;;  %v528_v38 = vor.u32 %v635_v34, %v525_v35  ;;  %v517_v41 = vld [vmem:[%s988_s3 + $0x48] sm:$0xf0]  ;;  %v649_v42 = vld [vmem:[%s988_s3 + $0xc4] sm:$0xf] }
  0x19   :  { %142 = vmatpush.bf16.msra.mxu1 %v440_v56  ;;  %356 = vmatpush.bf16.msra.mxu2 %v508_v14  ;;  %v592_v39 = vor.u32 %v651_v36, %v589_v37  ;;  %v581_v43 = vld [vmem:[%s988_s3 + $0xc8] sm:$0xf0]  ;;  %v520_v44 = vor.u32 %v633_v40, %v517_v41  ;;  %v631_v46 = vld [vmem:[%s988_s3 + $0x34] sm:$0xf]  ;;  %v509_v47 = vld [vmem:[%s988_s3 + $0x38] sm:$0xf0] }
  0x1a   :  { %v584_v45 = vor.u32 %v649_v42, %v581_v43  ;;  %v647_v48 = vld [vmem:[%s988_s3 + $0xb4] sm:$0xf]  ;;  %v573_v49 = vld [vmem:[%s988_s3 + $0xb8] sm:$0xf0]  ;;  %v512_v50 = vor.u32 %v631_v46, %v509_v47  ;;  %v629_v52 = vld [vmem:[%s988_s3 + $0x24] sm:$0xf] }
  0x1b   :  { %369 = vmatpush.bf16.msra.mxu3 %v572_v17  ;;  %v576_v51 = vor.u32 %v647_v48, %v573_v49  ;;  %v501_v53 = vld [vmem:[%s988_s3 + $0x28] sm:$0xf0]  ;;  %v645_v54 = vld [vmem:[%s988_s3 + $0xa4] sm:$0xf]  ;;  %v491_v58 = vld [vmem:[%s988_s3 + $0x10] sm:$0xf] }
  0x1c   :  { %130 = vmatpush.bf16.msra.mxu0 %v428_v0  ;;  %v565_v55 = vld [vmem:[%s988_s3 + $0xa8] sm:$0xf0]  ;;  %v504_v56 = vor.u32 %v629_v52, %v501_v53  ;;  %v628_v59 = vld [vmem:[%s988_s3 + $0x14] sm:$0xf0]  ;;  %v555_v60 = vld [vmem:[%s988_s3 + $0x90] sm:$0xf] }
  0x1d   :  { %143 = vmatpush.bf16.msra.mxu1 %v432_v5  ;;  %357 = vmatpush.bf16.msra.mxu2 %v500_v30  ;;  %v568_v57 = vor.u32 %v645_v54, %v565_v55  ;;  %v492_v61 = vor.u32 %v628_v59, %v491_v58  ;;  %v644_v62 = vld [vmem:[%s988_s3 + $0x94] sm:$0xf0]  ;;  %v627_v63 = vld [vmem:[%s988_s3 + $0x14] sm:$0xf]  ;;  %v493_v0 = vld [vmem:[%s988_s3 + $0x18] sm:$0xf0] }
  0x1e   :  { %v556_v1 = vor.u32 %v644_v62, %v555_v60  ;;  %v496_v2 = vor.u32 %v627_v63, %v493_v0  ;;  %v643_v3 = vld [vmem:[%s988_s3 + $0x94] sm:$0xf]  ;;  %v557_v4 = vld [vmem:[%s988_s3 + $0x98] sm:$0xf0]  ;;  %v483_v6 = vld [vmem:[%s988_s3] sm:$0xf] }
  0x1f   :  { %370 = vmatpush.bf16.msra.mxu3 %v564_v31  ;;  %v560_v5 = vor.u32 %v643_v3, %v557_v4  ;;  %v626_v7 = vld [vmem:[%s988_s3 + $0x4] sm:$0xf0]  ;;  %v547_v8 = vld [vmem:[%s988_s3 + $0x80] sm:$0xf]  ;;  %v625_v11 = vld [vmem:[%s988_s3 + $0x4] sm:$0xf] }
  0x20   :  { %131 = vmatpush.bf16.msra.mxu0 %v420_v15  ;;  %v484_v9 = vor.u32 %v626_v7, %v483_v6  ;;  %v642_v10 = vld [vmem:[%s988_s3 + $0x84] sm:$0xf0]  ;;  %v485_v12 = vld [vmem:[%s988_s3 + $0x8] sm:$0xf0]  ;;  %v641_v15 = vld [vmem:[%s988_s3 + $0x84] sm:$0xf] }
  0x21   :  { %144 = vmatpush.bf16.msra.mxu1 %v424_v20  ;;  %358 = vmatpush.bf16.msra.mxu2 %v492_v61  ;;  %v548_v13 = vor.u32 %v642_v10, %v547_v8  ;;  %v488_v14 = vor.u32 %v625_v11, %v485_v12  ;;  %v549_v16 = vld [vmem:[%s988_s3 + $0x88] sm:$0xf0]  ;;  %v38_v18 = vld [vmem:[%s990_s2] sm:$0x3] }
  0x22   :  { %v552_v17 = vor.u32 %v641_v15, %v549_v16  ;;  %v40_v19 = vperm.slane %v38_v18, 0  ;;  %v41_v20 = vperm.slane %v38_v18, 1  ;;  %v186_v31 = vld [vmem:[%s991_s4] sm:$0x3] }
  0x23   :  { %132 = vmatmul.bf16.vlgmr.msra.gmra.mxu0 %v21_v27  ;;  %371 = vmatpush.bf16.msra.mxu3 %v556_v1  ;;  %v188_v35 = vperm.slane %v186_v31, 0 }
  0x24   :  { %378 = vmatpush.bf16.msrb.mxu0 %v544_v21  ;;  %145 = vmatmul.bf16.vlgmr.msra.gmra.mxu1 %v21_v27 }
  0x25   :  { %391 = vmatpush.bf16.msrb.mxu1 %v608_v24  ;;  %359 = vmatpush.bf16.msra.mxu2 %v484_v9 }
  0x27   :  { %372 = vmatpush.bf16.msra.mxu3 %v548_v13 }
  0x28   :  { %379 = vmatpush.bf16.msrb.mxu0 %v536_v32 }
  0x29   :  { %392 = vmatpush.bf16.msrb.mxu1 %v600_v33  ;;  %v189_v33 = vperm.slane %v186_v31, 1 }
  0x2c   :  { %380 = vmatpush.bf16.msrb.mxu0 %v528_v38 }
  0x2d   :  { %393 = vmatpush.bf16.msrb.mxu1 %v592_v39 }
  0x30   :  { %381 = vmatpush.bf16.msrb.mxu0 %v520_v44 }
  0x31   :  { %394 = vmatpush.bf16.msrb.mxu1 %v584_v45 }
  0x34   :  { %382 = vmatpush.bf16.msrb.mxu0 %v512_v50 }
  0x35   :  { %395 = vmatpush.bf16.msrb.mxu1 %v576_v51 }
  0x38   :  { %383 = vmatpush.bf16.msrb.mxu0 %v504_v56 }
  0x39   :  { %396 = vmatpush.bf16.msrb.mxu1 %v568_v57 }
  0x3c   :  { %384 = vmatpush.bf16.msrb.mxu0 %v496_v2 }
  0x3d   :  { %397 = vmatpush.bf16.msrb.mxu1 %v560_v5 }
  0x40   :  { %385 = vmatpush.bf16.msrb.mxu0 %v488_v14 }
  0x41   :  { %398 = vmatpush.bf16.msrb.mxu1 %v552_v17 }
  0xa0   :  { %v133_v21 = vpop.f32.mrf.mxu0 }
  0xa1   :  { %v134_v22 = vadd.f32 %v133_v21, %v40_v19  ;;  %v146_v23 = vpop.f32.mrf.mxu1 }
  0xa2   :  { %v147_v24 = vadd.f32 %v146_v23, %v41_v20 }
  0xa3   :  { %v150_v25 = vmax.f32 %v134_v22, 0.0 }
  0xa4   :  { %v151_v26 = vmax.f32 %v147_v24, 0.0 }
  0xa5   :  { %v152_v27 = vpack.c.bf16 %v150_v25, %v150_v25 }
  0xa6   :  { %v153_v28 = vpack.c.bf16 %v151_v26, %v151_v26 }
  0xa7   :  { %360 = vmatmul.bf16.vlgmr.msra.gmra.mxu2 %v152_v27  ;;  %386 = vmatmul.bf16.vlgmr.msrb.gmra.mxu0 %v152_v27 }
  0xa8   :  { %373 = vmatmul.bf16.vlgmr.msra.gmra.mxu3 %v153_v28  ;;  %399 = vmatmul.bf16.vlgmr.msrb.gmra.mxu1 %v153_v28  ;;  %v135_v29 = vpop.f32.mrf.mxu0 }
  0xa9   :  { %v148_v30 = vpop.f32.mrf.mxu1 }
 0x124   :  { %v387_v32 = vpop.f32.mrf.mxu0 }
 0x125   :  { %v400_v34 = vpop.f32.mrf.mxu1  ;;  %v388_v36 = vadd.f32 %v387_v32, %v189_v33 }
 0x127   :  { %v401_v41 = vadd.f32 %v400_v34, %v388_v36 }
 0x12a   :  { %v361_v37 = vpop.f32.mrf.mxu2 }
 0x12b   :  { %v362_v38 = vadd.f32 %v361_v37, %v188_v35  ;;  %v374_v39 = vpop.f32.mrf.mxu3 }
 0x12c   :  { %v389_v40 = vpop.f32.mrf.mxu0 }
 0x12d   :  { %v375_v42 = vadd.f32 %v374_v39, %v362_v38  ;;  %v402_v43 = vpop.f32.mrf.mxu1 }
 0x12f   :  { %v404_v44 = vpack.c.bf16 %v401_v41, %v375_v42 }
 0x131   :  { %v406_v45 = vrot.slane %v404_v44, 2 }
 0x132   :  { %v363_v46 = vpop.f32.mrf.mxu2 }
 0x133   :  { %v410_v47 = vsel %vm407_vm0, %v404_v44, %v406_v45  ;;  %v376_v48 = vpop.f32.mrf.mxu3 }
 0x134   :  { %412 = vst [vmem:[%s992_s5] sm:$0xf] %v410_v47 }

</bundles_post_ra>
